<compile_context>
chip_gen: v6e
topology: v6e:2x2x1
jax: 0.10.0
libtpu: 0.0.40
codegen_flags: <defaults>
</compile_context>

<pallas_src>
import math

import jax
import jax.numpy as jnp
from jax.experimental import pallas as pl
from jax.experimental.pallas import tpu as pltpu

_HI = jax.lax.Precision.HIGHEST   # only used in the one-time fold / reference

_MIN_TILE = 256     # never honor batch tiles smaller than this
_MAX_TILE = 2048    # 2048 rows * 1 KiB/row * 2 (in+out) * 2 buffers ~ 8 MiB VMEM


# ----------------------------------------------------------------------------
# Kernel: one lane-dense GEMM per batch tile, with in-VMEM relayout.
# ----------------------------------------------------------------------------
def _fused_mha_kernel(x_ref, w_ref, b_ref, out_ref):
    # x_ref:   (L, TB, E)   query tile in its native (L, N, E) layout
    # w_ref:   (L*E, L*E)   fused (softmax x in-proj x out-proj) operator, bf16
    # b_ref:   (1, L*E)     fused bias, f32
    # out_ref: (L, TB, E)   attention output tile (native layout, query dtype)
    L, _, E = x_ref.shape

    # (L, TB, E) -> (TB, L*E): lane concatenation of the L source rows.
    # x_flat[b, s*E + e] = query[s, b, e]   (matches the row ordering of W_big)
    x_flat = jnp.concatenate([x_ref[s] for s in range(L)], axis=-1)

    # Single-pass MXU matmul: bf16 operands, f32 accumulation.
    acc = jnp.dot(x_flat.astype(w_ref.dtype), w_ref[...],
                  preferred_element_type=jnp.float32)
    acc = acc + b_ref[...]

    # (TB, L*E) -> (L, TB, E): static lane slices written per target position.
    for l in range(L):
        out_ref[l, :, :] = acc[:, l * E:(l + 1) * E].astype(out_ref.dtype)


# ----------------------------------------------------------------------------
# One-time (per parameter set) fold.  Hoist this out of the forward path and
# cache the returned device arrays.
# ----------------------------------------------------------------------------
def precompute_fused_operator(params, num_heads):
    f32 = jnp.float32
    n_cat, E = params["fixed_q"].shape
    L = n_cat
    hd = E // num_heads
    assert hd * num_heads == E, "embed_dim must be divisible by num_heads"
    scaling = float(hd) ** -0.5

    fq = params["fixed_q"].astype(f32) * scaling                # (L, E)
    fk = params["fixed_k"].astype(f32)                          # (S, E), S == L
    qh = fq.reshape(L, num_heads, hd).transpose(1, 0, 2)        # (H, L, hd)
    kh = fk.reshape(L, num_heads, hd).transpose(1, 0, 2)        # (H, S, hd)
    scores = jnp.einsum("hld,hsd->hls", qh, kh, precision=_HI)  # (H, L, S)
    P = jax.nn.softmax(scores, axis=-1)                         # (H, L, S)
    w_avg = jnp.mean(P, axis=0)                                 # (L, S)

    win_t = params["in_proj_weight"].astype(f32).T              # (E, E): x @ W_in^T
    wout_t = params["out_proj_weight"].astype(f32).T            # (E, E)
    b_in = params["in_proj_bias"].astype(f32)
    b_out = params["out_proj_bias"].astype(f32)

    # G_h = W_in^T[:, h*hd:(h+1)*hd] @ W_out^T[h*hd:(h+1)*hd, :]  -> (H, E, E)
    G = jnp.einsum("ahd,hdf->haf",
                   win_t.reshape(E, num_heads, hd),
                   wout_t.reshape(num_heads, hd, E), precision=_HI)

    # W_big[s*E+e, l*E+f] = sum_h P_h[l, s] * G_h[e, f]
    W_big = jnp.einsum("hls,hef->self", P, G,
                       precision=_HI).reshape(L * E, L * E)

    # Bias path carried exactly via rowsum(P_h).
    rowsum = jnp.sum(P, axis=-1)                                # (H, L)
    bias_attn = jnp.einsum("hl,hd->lhd", rowsum,
                           b_in.reshape(num_heads, hd)).reshape(L, E)
    bias_out = jnp.einsum("le,fe->lf", bias_attn,
                          params["out_proj_weight"].astype(f32),
                          precision=_HI) + b_out                # (L, E)

    return {
        "W": W_big.astype(jnp.bfloat16),          # bf16 operand for the MXU
        "bias": bias_out.reshape(1, L * E),       # f32, added post-accumulation
        "w_avg": w_avg,                           # (L, S) batch-invariant weights
        "L": L, "E": E, "num_heads": num_heads,
    }


# ----------------------------------------------------------------------------
# Batch-tile selection (review items: >=256-row floor, >=2 grid steps for
# large N so both v7x TensorCores get work).
# ----------------------------------------------------------------------------
def _round_up(x, m):
    return -(-x // m) * m


def _select_batch_tile(N, batch_tile):
    cap = max(_MIN_TILE, min(int(batch_tile), _MAX_TILE))
    cap -= cap % 8
    if N < 2 * _MIN_TILE:
        tb = N                                   # single block == full batch dim
    else:
        half = _round_up((N + 1) // 2, 8)        # ensure >= 2 parallel grid steps
        tb = min(cap, half)
    n_pad = N if tb == N else _round_up(N, tb)
    return tb, n_pad


# ----------------------------------------------------------------------------
# Forward pass using a precomputed fused operator.
# ----------------------------------------------------------------------------
def mha_forward(query, fused_op, *, batch_tile=512):
    """query: (L, N, E).  Returns (attn_output (L, N, E), attn_weights (N, L, S))."""
    L, N, E = query.shape
    assert L == fused_op["L"], "modified MHA requires n_cat_embeddings == target length"
    assert E == fused_op["E"]
    D = L * E

    tb, n_pad = _select_batch_tile(N, batch_tile)
    xq = query if n_pad == N else jnp.pad(query, ((0, 0), (0, n_pad - N), (0, 0)))

    const = lambda b: (0, 0)
    out = pl.pallas_call(
        _fused_mha_kernel,
        out_shape=jax.ShapeDtypeStruct((L, n_pad, E), query.dtype),
        grid_spec=pltpu.PrefetchScalarGridSpec(
            num_scalar_prefetch=0,
            grid=(n_pad // tb,),
            in_specs=[
                pl.BlockSpec((L, tb, E), lambda b: (0, b, 0)),   # native query tile
                pl.BlockSpec((D, D), const),                     # fused weight (resident)
                pl.BlockSpec((1, D), const),                     # fused bias   (resident)
            ],
            out_specs=pl.BlockSpec((L, tb, E), lambda b: (0, b, 0)),
        ),
        compiler_params=pltpu.CompilerParams(
            dimension_semantics=("parallel",)),
    )(xq, fused_op["W"], fused_op["bias"])

    attn_out = out if n_pad == N else out[:, :N, :]
    n_cat = fused_op["w_avg"].shape[1]
    # Attention weights are identical for every batch element; broadcast once.
    attn_weights = jnp.broadcast_to(fused_op["w_avg"][None, :, :], (N, L, n_cat))
    return attn_out, attn_weights


def multihead_attention_pallas(query, key, value, params, num_heads,
                               batch_tile=512, fused_op=None):
    """Convenience wrapper matching the module call signature.  `key`/`value`
    are accepted for API fidelity but (as in the modified PyTorch forward)
    the value projection is taken from `query` and q/k are fixed parameters.
    Pass a cached `fused_op` (from precompute_fused_operator) to avoid
    re-folding the parameters on every call."""
    del key, value
    if fused_op is None:
        fused_op = precompute_fused_operator(params, num_heads)
    return mha_forward(query, fused_op, batch_tile=batch_tile)


# ----------------------------------------------------------------------------
# Synthetic parameters + pure-JAX reference for validation.
# ----------------------------------------------------------------------------
def init_params(key, embed_dim, n_cat_embeddings):
    """Deterministic synthetic init mirroring the module's parameter shapes.
    (The module zero-inits biases; small non-zero biases are used here so the
    fused bias path is actually exercised by the correctness check.)"""
    k1, k2, k3, k4, k5, k6 = jax.random.split(key, 6)

    def xav(k, shape):
        b = math.sqrt(6.0 / (shape[0] + shape[1]))
        return jax.random.uniform(k, shape, jnp.float32, -b, b)

    bound = 1.0 / math.sqrt(embed_dim)
    return {
        "in_proj_weight": xav(k1, (embed_dim, embed_dim)),
        "in_proj_bias": jax.random.uniform(k5, (embed_dim,), jnp.float32, -bound, bound),
        "fixed_k": xav(k2, (n_cat_embeddings, embed_dim)),
        "fixed_q": xav(k3, (n_cat_embeddings, embed_dim)),
        "out_proj_weight": jax.random.uniform(
            k4, (embed_dim, embed_dim), jnp.float32, -bound, bound),
        "out_proj_bias": jax.random.uniform(k6, (embed_dim,), jnp.float32, -bound, bound),
    }


def reference_forward(query, params, num_heads):
    """Pure-JAX reference matching the PyTorch forward, for validation."""
    L, N, E = query.shape
    hd = E // num_heads
    scaling = float(hd) ** -0.5
    v = jnp.einsum("lne,fe->lnf", query, params["in_proj_weight"],
                   precision=_HI) + params["in_proj_bias"]
    k = jnp.broadcast_to(params["fixed_k"][:, None, :], (L, N, E))
    q = jnp.broadcast_to(params["fixed_q"][:, None, :], (L, N, E)) * scaling

    def split_heads(t):
        return jnp.transpose(t.reshape(L, N * num_heads, hd), (1, 0, 2))

    q, k, v = split_heads(q), split_heads(k), split_heads(v)
    w = jax.nn.softmax(jnp.einsum("bld,bsd->bls", q, k, precision=_HI), axis=-1)
    a = jnp.einsum("bls,bsd->bld", w, v, precision=_HI)
    a = jnp.transpose(a, (1, 0, 2)).reshape(L, N, E)
    out = jnp.einsum("lne,fe->lnf", a, params["out_proj_weight"],
                     precision=_HI) + params["out_proj_bias"]
    w_avg = w.reshape(N, num_heads, L, L).mean(axis=1)
    return out, w_avg


if __name__ == "__main__":
    # Module-consistent small shapes: embed_dim E = 32, heads H = 4,
    # n_cat_embeddings = L = 8.  Batch sizes exercise: tiny single block,
    # medium single block, and a padded 2-step grid (dual-TC path on v7x).
    E, H, L = 32, 4, 8
    key0 = jax.random.PRNGKey(0)
    kq, kk, kv, kp = jax.random.split(key0, 4)
    params = init_params(kp, E, L)

    # Hoisted fold: built ONCE per parameter set and reused for every forward.
    fused = precompute_fused_operator(params, H)
    jax.block_until_ready(fused["W"])

    for N in (2, 40, 600):
        query = jax.random.normal(jax.random.fold_in(kq, N), (L, N, E), jnp.float32)
        key_in = jax.random.normal(jax.random.fold_in(kk, N), (L, N, E), jnp.float32)
        value_in = jax.random.normal(jax.random.fold_in(kv, N), (L, N, E), jnp.float32)

        attn_out, attn_w = multihead_attention_pallas(
            query, key_in, value_in, params, H, fused_op=fused)
        attn_out = jax.block_until_ready(attn_out)
        attn_w = jax.block_until_ready(attn_w)

        ref_out, ref_w = reference_forward(query, params, H)
        assert attn_out.shape == (L, N, E) and attn_w.shape == (N, L, L)
        err_o = float(jnp.max(jnp.abs(attn_out - ref_out)))
        err_w = float(jnp.max(jnp.abs(attn_w - ref_w)))
        # bf16 operands on the MXU (f32 accumulate) over a K=256 contraction:
        # tolerance loosened vs. the old f32-HIGHEST path (per perf review).
        assert jnp.allclose(attn_out, ref_out, atol=2e-2, rtol=2e-2), err_o
        assert jnp.allclose(attn_w, ref_w, atol=1e-5, rtol=1e-5), err_w

    print("KERNEL_OK")
</pallas_src>

<mosaic_0001>
module attributes {stable_mosaic.version = 11 : i64} {
  func.func @_fused_mha_kernel(%arg0: i32, %arg1: memref<8x2x32xf32, #tpu.memory_space<vmem>>, %arg2: memref<256x256xbf16, #tpu.memory_space<vmem>>, %arg3: memref<1x256xf32, #tpu.memory_space<vmem>>, %arg4: memref<8x2x32xf32, #tpu.memory_space<vmem>>) attributes {dimension_semantics = [#tpu.dimension_semantics<parallel>], iteration_bounds = array<i64: 1>, scalar_prefetch = 0 : i64, scratch_operands = 0 : i64, tpu.core_type = #tpu.core_type<tc>, window_params = [{transform_indices = @transform_0, window_bounds = array<i64: 8, 2, 32>}, {pipeline_mode = #tpu.pipeline_mode<synchronous>, transform_indices = @transform_1, window_bounds = array<i64: 256, 256>}, {pipeline_mode = #tpu.pipeline_mode<synchronous>, transform_indices = @transform_2, window_bounds = array<i64: 1, 256>}, {transform_indices = @transform_3, window_bounds = array<i64: 8, 2, 32>}]} {
    %c0 = arith.constant 0 : index
    %c0_0 = arith.constant 0 : index
    %c0_1 = arith.constant 0 : index
    %0 = vector.load %arg1[%c0, %c0_0, %c0_1] : memref<8x2x32xf32, #tpu.memory_space<vmem>>, vector<1x2x32xf32>
    %1 = vector.shape_cast %0 : vector<1x2x32xf32> to vector<2x32xf32>
    %c1 = arith.constant 1 : index
    %c0_2 = arith.constant 0 : index
    %c0_3 = arith.constant 0 : index
    %2 = vector.load %arg1[%c1, %c0_2, %c0_3] : memref<8x2x32xf32, #tpu.memory_space<vmem>>, vector<1x2x32xf32>
    %3 = vector.shape_cast %2 : vector<1x2x32xf32> to vector<2x32xf32>
    %c2 = arith.constant 2 : index
    %c0_4 = arith.constant 0 : index
    %c0_5 = arith.constant 0 : index
    %4 = vector.load %arg1[%c2, %c0_4, %c0_5] : memref<8x2x32xf32, #tpu.memory_space<vmem>>, vector<1x2x32xf32>
    %5 = vector.shape_cast %4 : vector<1x2x32xf32> to vector<2x32xf32>
    %c3 = arith.constant 3 : index
    %c0_6 = arith.constant 0 : index
    %c0_7 = arith.constant 0 : index
    %6 = vector.load %arg1[%c3, %c0_6, %c0_7] : memref<8x2x32xf32, #tpu.memory_space<vmem>>, vector<1x2x32xf32>
    %7 = vector.shape_cast %6 : vector<1x2x32xf32> to vector<2x32xf32>
    %c4 = arith.constant 4 : index
    %c0_8 = arith.constant 0 : index
    %c0_9 = arith.constant 0 : index
    %8 = vector.load %arg1[%c4, %c0_8, %c0_9] : memref<8x2x32xf32, #tpu.memory_space<vmem>>, vector<1x2x32xf32>
    %9 = vector.shape_cast %8 : vector<1x2x32xf32> to vector<2x32xf32>
    %c5 = arith.constant 5 : index
    %c0_10 = arith.constant 0 : index
    %c0_11 = arith.constant 0 : index
    %10 = vector.load %arg1[%c5, %c0_10, %c0_11] : memref<8x2x32xf32, #tpu.memory_space<vmem>>, vector<1x2x32xf32>
    %11 = vector.shape_cast %10 : vector<1x2x32xf32> to vector<2x32xf32>
    %c6 = arith.constant 6 : index
    %c0_12 = arith.constant 0 : index
    %c0_13 = arith.constant 0 : index
    %12 = vector.load %arg1[%c6, %c0_12, %c0_13] : memref<8x2x32xf32, #tpu.memory_space<vmem>>, vector<1x2x32xf32>
    %13 = vector.shape_cast %12 : vector<1x2x32xf32> to vector<2x32xf32>
    %c7 = arith.constant 7 : index
    %c0_14 = arith.constant 0 : index
    %c0_15 = arith.constant 0 : index
    %14 = vector.load %arg1[%c7, %c0_14, %c0_15] : memref<8x2x32xf32, #tpu.memory_space<vmem>>, vector<1x2x32xf32>
    %15 = vector.shape_cast %14 : vector<1x2x32xf32> to vector<2x32xf32>
    %16 = tpu.concatenate %1, %3, %5, %7, %9, %11, %13, %15 in 1 : vector<2x32xf32>, vector<2x32xf32>, vector<2x32xf32>, vector<2x32xf32>, vector<2x32xf32>, vector<2x32xf32>, vector<2x32xf32>, vector<2x32xf32> -> vector<2x256xf32>
    %17 = arith.truncf %16 : vector<2x256xf32> to vector<2x256xbf16>
    %c0_16 = arith.constant 0 : index
    %c0_17 = arith.constant 0 : index
    %18 = vector.load %arg2[%c0_16, %c0_17] : memref<256x256xbf16, #tpu.memory_space<vmem>>, vector<256x256xbf16>
    %cst = arith.constant dense<0.000000e+00> : vector<2x256xf32>
    %19 = tpu.matmul %17, %18, %cst {dimension_numbers = #tpu.dot_dimension_numbers<[1], [0], [0], [1], [0, 0, 1, 1], [], []>} : vector<2x256xbf16>, vector<256x256xbf16>, vector<2x256xf32> -> vector<2x256xf32>
    %c0_18 = arith.constant 0 : index
    %c0_19 = arith.constant 0 : index
    %20 = vector.load %arg3[%c0_18, %c0_19] : memref<1x256xf32, #tpu.memory_space<vmem>>, vector<1x256xf32>
    %21 = vector.broadcast %20 : vector<1x256xf32> to vector<2x256xf32>
    %22 = arith.addf %19, %21 : vector<2x256xf32>
    %23 = vector.extract_strided_slice %22 {offsets = [0, 0], sizes = [2, 32], strides = [1, 1]} : vector<2x256xf32> to vector<2x32xf32>
    %c0_20 = arith.constant 0 : index
    %c0_21 = arith.constant 0 : index
    %c0_22 = arith.constant 0 : index
    %24 = vector.load %arg4[%c0_20, %c0_21, %c0_22] : memref<8x2x32xf32, #tpu.memory_space<vmem>>, vector<1x2x32xf32>
    %25 = vector.shape_cast %24 : vector<1x2x32xf32> to vector<2x32xf32>
    %26 = vector.shape_cast %23 : vector<2x32xf32> to vector<1x2x32xf32>
    tpu.vector_store %arg4[%c0_20, %c0_21, %c0_22], %26 {strides = array<i32>} : memref<8x2x32xf32, #tpu.memory_space<vmem>>, vector<1x2x32xf32>,
    %27 = vector.extract_strided_slice %22 {offsets = [0, 32], sizes = [2, 32], strides = [1, 1]} : vector<2x256xf32> to vector<2x32xf32>
    %c1_23 = arith.constant 1 : index
    %c0_24 = arith.constant 0 : index
    %c0_25 = arith.constant 0 : index
    %28 = vector.load %arg4[%c1_23, %c0_24, %c0_25] : memref<8x2x32xf32, #tpu.memory_space<vmem>>, vector<1x2x32xf32>
    %29 = vector.shape_cast %28 : vector<1x2x32xf32> to vector<2x32xf32>
    %30 = vector.shape_cast %27 : vector<2x32xf32> to vector<1x2x32xf32>
    tpu.vector_store %arg4[%c1_23, %c0_24, %c0_25], %30 {strides = array<i32>} : memref<8x2x32xf32, #tpu.memory_space<vmem>>, vector<1x2x32xf32>,
    %31 = vector.extract_strided_slice %22 {offsets = [0, 64], sizes = [2, 32], strides = [1, 1]} : vector<2x256xf32> to vector<2x32xf32>
    %c2_26 = arith.constant 2 : index
    %c0_27 = arith.constant 0 : index
    %c0_28 = arith.constant 0 : index
    %32 = vector.load %arg4[%c2_26, %c0_27, %c0_28] : memref<8x2x32xf32, #tpu.memory_space<vmem>>, vector<1x2x32xf32>
    %33 = vector.shape_cast %32 : vector<1x2x32xf32> to vector<2x32xf32>
    %34 = vector.shape_cast %31 : vector<2x32xf32> to vector<1x2x32xf32>
    tpu.vector_store %arg4[%c2_26, %c0_27, %c0_28], %34 {strides = array<i32>} : memref<8x2x32xf32, #tpu.memory_space<vmem>>, vector<1x2x32xf32>,
    %35 = vector.extract_strided_slice %22 {offsets = [0, 96], sizes = [2, 32], strides = [1, 1]} : vector<2x256xf32> to vector<2x32xf32>
    %c3_29 = arith.constant 3 : index
    %c0_30 = arith.constant 0 : index
    %c0_31 = arith.constant 0 : index
    %36 = vector.load %arg4[%c3_29, %c0_30, %c0_31] : memref<8x2x32xf32, #tpu.memory_space<vmem>>, vector<1x2x32xf32>
    %37 = vector.shape_cast %36 : vector<1x2x32xf32> to vector<2x32xf32>
    %38 = vector.shape_cast %35 : vector<2x32xf32> to vector<1x2x32xf32>
    tpu.vector_store %arg4[%c3_29, %c0_30, %c0_31], %38 {strides = array<i32>} : memref<8x2x32xf32, #tpu.memory_space<vmem>>, vector<1x2x32xf32>,
    %39 = vector.extract_strided_slice %22 {offsets = [0, 128], sizes = [2, 32], strides = [1, 1]} : vector<2x256xf32> to vector<2x32xf32>
    %c4_32 = arith.constant 4 : index
    %c0_33 = arith.constant 0 : index
    %c0_34 = arith.constant 0 : index
    %40 = vector.load %arg4[%c4_32, %c0_33, %c0_34] : memref<8x2x32xf32, #tpu.memory_space<vmem>>, vector<1x2x32xf32>
    %41 = vector.shape_cast %40 : vector<1x2x32xf32> to vector<2x32xf32>
    %42 = vector.shape_cast %39 : vector<2x32xf32> to vector<1x2x32xf32>
    tpu.vector_store %arg4[%c4_32, %c0_33, %c0_34], %42 {strides = array<i32>} : memref<8x2x32xf32, #tpu.memory_space<vmem>>, vector<1x2x32xf32>,
    %43 = vector.extract_strided_slice %22 {offsets = [0, 160], sizes = [2, 32], strides = [1, 1]} : vector<2x256xf32> to vector<2x32xf32>
    %c5_35 = arith.constant 5 : index
    %c0_36 = arith.constant 0 : index
    %c0_37 = arith.constant 0 : index
    %44 = vector.load %arg4[%c5_35, %c0_36, %c0_37] : memref<8x2x32xf32, #tpu.memory_space<vmem>>, vector<1x2x32xf32>
    %45 = vector.shape_cast %44 : vector<1x2x32xf32> to vector<2x32xf32>
    %46 = vector.shape_cast %43 : vector<2x32xf32> to vector<1x2x32xf32>
    tpu.vector_store %arg4[%c5_35, %c0_36, %c0_37], %46 {strides = array<i32>} : memref<8x2x32xf32, #tpu.memory_space<vmem>>, vector<1x2x32xf32>,
    %47 = vector.extract_strided_slice %22 {offsets = [0, 192], sizes = [2, 32], strides = [1, 1]} : vector<2x256xf32> to vector<2x32xf32>
    %c6_38 = arith.constant 6 : index
    %c0_39 = arith.constant 0 : index
    %c0_40 = arith.constant 0 : index
    %48 = vector.load %arg4[%c6_38, %c0_39, %c0_40] : memref<8x2x32xf32, #tpu.memory_space<vmem>>, vector<1x2x32xf32>
    %49 = vector.shape_cast %48 : vector<1x2x32xf32> to vector<2x32xf32>
    %50 = vector.shape_cast %47 : vector<2x32xf32> to vector<1x2x32xf32>
    tpu.vector_store %arg4[%c6_38, %c0_39, %c0_40], %50 {strides = array<i32>} : memref<8x2x32xf32, #tpu.memory_space<vmem>>, vector<1x2x32xf32>,
    %51 = vector.extract_strided_slice %22 {offsets = [0, 224], sizes = [2, 32], strides = [1, 1]} : vector<2x256xf32> to vector<2x32xf32>
    %c7_41 = arith.constant 7 : index
    %c0_42 = arith.constant 0 : index
    %c0_43 = arith.constant 0 : index
    %52 = vector.load %arg4[%c7_41, %c0_42, %c0_43] : memref<8x2x32xf32, #tpu.memory_space<vmem>>, vector<1x2x32xf32>
    %53 = vector.shape_cast %52 : vector<1x2x32xf32> to vector<2x32xf32>
    %54 = vector.shape_cast %51 : vector<2x32xf32> to vector<1x2x32xf32>
    tpu.vector_store %arg4[%c7_41, %c0_42, %c0_43], %54 {strides = array<i32>} : memref<8x2x32xf32, #tpu.memory_space<vmem>>, vector<1x2x32xf32>,
    return
  }
  func.func @transform_0(%arg0: i32) -> (i32, i32, i32) {
    %c0_i32 = arith.constant 0 : i32
    %c0_i32_0 = arith.constant 0 : i32
    %c0_i32_1 = arith.constant 0 : i32
    return %c0_i32, %arg0, %c0_i32_0 : i32, i32, i32
  }
  func.func @transform_1(%arg0: i32) -> (i32, i32) {
    %c0_i32 = arith.constant 0 : i32
    %c0_i32_0 = arith.constant 0 : i32
    %c0_i32_1 = arith.constant 0 : i32
    return %c0_i32, %c0_i32_0 : i32, i32
  }
  func.func @transform_2(%arg0: i32) -> (i32, i32) {
    %c0_i32 = arith.constant 0 : i32
    %c0_i32_0 = arith.constant 0 : i32
    %c0_i32_1 = arith.constant 0 : i32
    return %c0_i32, %c0_i32_0 : i32, i32
  }
  func.func @transform_3(%arg0: i32) -> (i32, i32, i32) {
    %c0_i32 = arith.constant 0 : i32
    %c0_i32_0 = arith.constant 0 : i32
    %c0_i32_1 = arith.constant 0 : i32
    return %c0_i32, %arg0, %c0_i32_0 : i32, i32, i32
  }
}

</mosaic_0001>

<bundles_post_ra>
// kernel: tpu_custom_call.1
= control target key start
LH: loop header
LB: loop body
LE: loop exit
PB: predicated region body
PF: predicated region fallthrough
CT: control target
= control target key end

     0   :  { %8 = vsyncpa [#allocation3], 0  ;;  %s626_s0 = inlined_call_operand.hbm [shape: f32[8,2,32], index: 0, kind: input, shape index: {}]   ;;  %s627_s1 = inlined_call_operand.hbm [shape: bf16[256,256], index: 1, kind: input, shape index: {}]   ;;  %s628_s2 = inlined_call_operand.vmem [shape: f32[1,256], index: 2, kind: input, shape index: {}]   ;;  %s629_s3 = inlined_call_operand.hbm [shape: f32[8,2,32], index: 3, kind: output, shape index: {}]  }
   0x1   :  { %9 = vsyncpa [#allocation6], 0 }
   0x2   :  { %10 = vsyncpa [#allocation4], 0  ;;  %s562_s12 = smov [#allocation2]  }
   0x3   :  { %s16_s13 = sshll.u32 %s562_s12, 4  ;;  %s17_s13 = int_to_ptr.vmem [resolvable:$true] %s16_s13 }
   0x4   :  { %s504_s14 = scalar_lea.vmem %s17_s13, 256  ;;  %p509_p1 = scmp.lt.s32.totalorder %s17_s13, %s17_s13 }
   0x5   :  { %p505_p0 = scmp.ne.s32.totalorder %s17_s13, %s504_s14  ;;  %p510_p2 = scmp.lt.s32.totalorder %s504_s14, %s504_s14 }
   0x7   :  { %p511_p3 = por %p510_p2, %p509_p1 }
   0x9   :  { %p512_p4 = pnand %p511_p3, %p505_p0 }
   0xb   :  { %515 = shalt.err (!%p512_p4)
}
   0xc   :  { %s563_s15 = smov 32   ;;  %s564_s16 = smov 2  }
   0xd   :  { %22 = dma.hbm_to_vmem [thread:$0]  %s626_s0, 256, %s17_s13, [#allocation3], %s563_s15, %s563_s15, %s564_s16  }
   0xe   :  { %s565_s19 = smov [#allocation5]  }
   0xf   :  { %s28_s20 = sshll.u32 %s565_s19, 4  ;;  %s29_s20 = int_to_ptr.vmem [resolvable:$true] %s28_s20 }
  0x10   :  { %s524_s21 = scalar_lea.vmem %s29_s20, 4096  ;;  %p529_p6 = scmp.lt.s32.totalorder %s29_s20, %s29_s20 }
  0x11   :  { %p525_p5 = scmp.ne.s32.totalorder %s29_s20, %s524_s21  ;;  %p530_p7 = scmp.lt.s32.totalorder %s524_s21, %s524_s21 }
  0x13   :  { %p531_p8 = por %p530_p7, %p529_p6 }
  0x15   :  { %p532_p9 = pnand %p531_p8, %p525_p5 }
  0x17   :  { %535 = shalt.err (!%p532_p9)
}
  0x18   :  { %s566_s22 = smov 128   ;;  %s567_s23 = smov 8  }
  0x19   :  { %34 = dma.hbm_to_vmem [thread:$0]  %s627_s1, 4096, %s29_s20, [#allocation6], %s566_s22, %s566_s22, %s567_s23  }
  0x1a   :  { %556 = dma.done.wait [#allocation3], 256  }
  0x1b   :  { %557 = vsyncadd [#allocation3], 4294967040 }
  0x1c   :  { %558 = dma.done.wait [#allocation6], 4096  }
  0x1d   :  { %559 = vsyncadd [#allocation6], 4294963200  ;;  %v45_v0 = vld [vmem:[#allocation2 + $0x2] sm:$0x3]  ;;  %v53_v1 = vld [vmem:[#allocation2 + $0xa] sm:$0x3]  ;;  %v127_v60 = vlaneseq }
  0x1e   :  { %v47_v2 = vld [vmem:[#allocation2 + $0x4] sm:$0x3]  ;;  %v433_v3 = vpack.i.bf16 %v45_v0, %v53_v1  ;;  %v55_v4 = vld [vmem:[#allocation2 + $0xc] sm:$0x3]  ;;  %v49_v5 = vld [vmem:[#allocation2 + $0x6] sm:$0x3] }
  0x1f   :  { %v57_v6 = vld [vmem:[#allocation2 + $0xe] sm:$0x3]  ;;  %v438_v9 = vpack.i.bf16 %v47_v2, %v55_v4  ;;  %v450_v10 = vld [vmem:[#allocation5 + $0x70] ss:$8 sps:$4 sm:$0xff]   ;;  %s568_s0 = smov 96   ;;  %s569_s1 = smov 64  }
  0x20   :  { %v443_v7 = vpack.i.bf16 %v49_v5, %v57_v6  ;;  %v448_v8 = vld [vmem:[#allocation5 + $0x74] ss:$8 sps:$4 sm:$0xff]   ;;  %434 = vrot.lane.b32.xlu0 %v433_v3, %s563_s15  ;;  %v451_v11 = vld [vmem:[#allocation5 + $0x64] ss:$8 sps:$4 sm:$0xff]   ;;  %v453_v12 = vld [vmem:[#allocation5 + $0x60] ss:$8 sps:$4 sm:$0xff]  }
  0x21   :  { %297 = vmatprep.subr.bf16.mxu0 %v448_v8  ;;  %v454_v13 = vld [vmem:[#allocation5 + $0x54] ss:$8 sps:$4 sm:$0xff]   ;;  %v456_v14 = vld [vmem:[#allocation5 + $0x50] ss:$8 sps:$4 sm:$0xff]   ;;  %v457_v15 = vld [vmem:[#allocation5 + $0x44] ss:$8 sps:$4 sm:$0xff]  }
  0x22   :  { %444 = vrot.lane.b32.xlu1 %v443_v7, %s568_s0  ;;  %298 = vmatpush1.bf16.msra.mxu0 %v450_v10  ;;  %v459_v16 = vld [vmem:[#allocation5 + $0x40] ss:$8 sps:$4 sm:$0xff]   ;;  %v460_v17 = vld [vmem:[#allocation5 + $0x34] ss:$8 sps:$4 sm:$0xff]   ;;  %v462_v18 = vld [vmem:[#allocation5 + $0x30] ss:$8 sps:$4 sm:$0xff]  }
  0x23   :  { %299 = vmatprep.subr.bf16.mxu0 %v451_v11  ;;  %v463_v19 = vld [vmem:[#allocation5 + $0x24] ss:$8 sps:$4 sm:$0xff]   ;;  %v465_v20 = vld [vmem:[#allocation5 + $0x20] ss:$8 sps:$4 sm:$0xff]   ;;  %v466_v21 = vld [vmem:[#allocation5 + $0x14] ss:$8 sps:$4 sm:$0xff]  }
  0x24   :  { %439 = vrot.lane.b32.xlu0 %v438_v9, %s569_s1  ;;  %v468_v22 = vld [vmem:[#allocation5 + $0x10] ss:$8 sps:$4 sm:$0xff]   ;;  %v469_v23 = vld [vmem:[#allocation5 + $0x4] ss:$8 sps:$4 sm:$0xff]   ;;  %v471_v24 = vld [vmem:[#allocation5] ss:$8 sps:$4 sm:$0xff]  }
  0x25   :  { %v472_v25 = vld [vmem:[#allocation5 + $0xf4] ss:$8 sps:$4 sm:$0xff]   ;;  %v474_v26 = vld [vmem:[#allocation5 + $0xf0] ss:$8 sps:$4 sm:$0xff]   ;;  %v475_v27 = vld [vmem:[#allocation5 + $0xe4] ss:$8 sps:$4 sm:$0xff]  }
  0x26   :  { %300 = vmatpush1.bf16.msra.mxu0 %v453_v12  ;;  %v477_v28 = vld [vmem:[#allocation5 + $0xe0] ss:$8 sps:$4 sm:$0xff]   ;;  %v478_v29 = vld [vmem:[#allocation5 + $0xd4] ss:$8 sps:$4 sm:$0xff]   ;;  %v480_v30 = vld [vmem:[#allocation5 + $0xd0] ss:$8 sps:$4 sm:$0xff]  }
  0x27   :  { %301 = vmatprep.subr.bf16.mxu0 %v454_v13  ;;  %v481_v31 = vld [vmem:[#allocation5 + $0xc4] ss:$8 sps:$4 sm:$0xff]   ;;  %v483_v32 = vld [vmem:[#allocation5 + $0xc0] ss:$8 sps:$4 sm:$0xff]   ;;  %v484_v33 = vld [vmem:[#allocation5 + $0xb4] ss:$8 sps:$4 sm:$0xff]  }
  0x28   :  { %v486_v34 = vld [vmem:[#allocation5 + $0xb0] ss:$8 sps:$4 sm:$0xff]   ;;  %v487_v35 = vld [vmem:[#allocation5 + $0xa4] ss:$8 sps:$4 sm:$0xff]   ;;  %v489_v36 = vld [vmem:[#allocation5 + $0xa0] ss:$8 sps:$4 sm:$0xff]  }
  0x29   :  { %v490_v37 = vld [vmem:[#allocation5 + $0x94] ss:$8 sps:$4 sm:$0xff]   ;;  %v492_v38 = vld [vmem:[#allocation5 + $0x90] ss:$8 sps:$4 sm:$0xff]   ;;  %v493_v39 = vld [vmem:[#allocation5 + $0x84] ss:$8 sps:$4 sm:$0xff]  }
  0x2a   :  { %302 = vmatpush1.bf16.msra.mxu0 %v456_v14  ;;  %v495_v40 = vld [vmem:[#allocation5 + $0x80] ss:$8 sps:$4 sm:$0xff]   ;;  %vm82_vm0 = vcmask 261120   ;;  %v43_v45 = vld [vmem:[#allocation2] sm:$0x3]  ;;  %vm84_vm1 = vcmask 523264  }
  0x2b   :  { %303 = vmatprep.subr.bf16.mxu0 %v457_v15  ;;  %v51_v46 = vld [vmem:[#allocation2 + $0x8] sm:$0x3]  ;;  %vm86_vm2 = vcmask 785408   ;;  %v128_v61 = vshrl.u32 %v127_v60, 7  ;;  %v125_v63 = vld [vmem:[%s628_s2] sm:$0x3] }
  0x2c   :  { %vm338_vm3 = vcmask 254976   ;;  %s570_s2 = smov [#allocation7]  }
  0x2d   :  { %v129_v62 = vsub.s32 0, %v128_v61  ;;  %v133_v0 = vsub.s32 1, %v128_v61  ;;  %s379_s28 = sshll.u32 %s570_s2, 4  ;;  %s380_s28 = int_to_ptr.vmem [resolvable:$true] %s379_s28 }
  0x2e   :  { %304 = vmatpush1.bf16.msra.mxu0 %v459_v16  ;;  %s536_s29 = scalar_lea.vmem %s380_s28, 256  ;;  %p541_p11 = scmp.lt.s32.totalorder %s380_s28, %s380_s28 }
  0x2f   :  { %305 = vmatprep.subr.bf16.mxu0 %v460_v17  ;;  %v130_v1 = vrot.slane %v125_v63, %v129_v62  ;;  %v134_v2 = vrot.slane %v125_v63, %v133_v0  ;;  %p537_p10 = scmp.ne.s32.totalorder %s380_s28, %s536_s29  ;;  %p542_p12 = scmp.lt.s32.totalorder %s536_s29, %s536_s29 }
  0x31   :  { %p543_p13 = por %p542_p12, %p541_p11 }
  0x32   :  { %306 = vmatpush1.bf16.msra.mxu0 %v462_v18 }
  0x33   :  { %307 = vmatprep.subr.bf16.mxu0 %v463_v19  ;;  %p544_p0 = pnand %p543_p13, %p537_p10 }
  0x36   :  { %308 = vmatpush1.bf16.msra.mxu0 %v465_v20 }
  0x37   :  { %309 = vmatprep.subr.bf16.mxu0 %v466_v21 }
  0x3a   :  { %310 = vmatpush1.bf16.msra.mxu0 %v468_v22 }
  0x3b   :  { %311 = vmatprep.subr.bf16.mxu0 %v469_v23 }
  0x3e   :  { %312 = vmatpush1.bf16.msra.mxu0 %v471_v24 }
  0x3f   :  { %313 = vmatprep.subr.bf16.mxu0 %v472_v25 }
  0x42   :  { %314 = vmatpush2.bf16.msra.mxu0 %v474_v26 }
  0x43   :  { %315 = vmatprep.subr.bf16.mxu0 %v475_v27 }
  0x46   :  { %316 = vmatpush2.bf16.msra.mxu0 %v477_v28 }
  0x47   :  { %317 = vmatprep.subr.bf16.mxu0 %v478_v29 }
  0x4a   :  { %318 = vmatpush2.bf16.msra.mxu0 %v480_v30 }
  0x4b   :  { %319 = vmatprep.subr.bf16.mxu0 %v481_v31 }
  0x4e   :  { %320 = vmatpush2.bf16.msra.mxu0 %v483_v32 }
  0x4f   :  { %321 = vmatprep.subr.bf16.mxu0 %v484_v33 }
  0x52   :  { %322 = vmatpush2.bf16.msra.mxu0 %v486_v34 }
  0x53   :  { %323 = vmatprep.subr.bf16.mxu0 %v487_v35 }
  0x56   :  { %324 = vmatpush2.bf16.msra.mxu0 %v489_v36 }
  0x57   :  { %325 = vmatprep.subr.bf16.mxu0 %v490_v37 }
  0x5a   :  { %326 = vmatpush2.bf16.msra.mxu0 %v492_v38 }
  0x5b   :  { %327 = vmatprep.subr.bf16.mxu0 %v493_v39 }
  0x5e   :  { %328 = vmatpush2.bf16.msra.mxu0 %v495_v40 }
  0x92   :  { %v435_v41 = vpop.permute.xlu0 %434 }
  0x93   :  { %v437_v43 = vunpack.i.h.bf16 %v435_v41  ;;  %v436_v44 = vunpack.i.l.bf16 %v435_v41 }
  0x94   :  { %v445_v42 = vpop.permute.xlu1 %444 }
  0x95   :  { %v447_v48 = vunpack.i.h.bf16 %v445_v42  ;;  %v446_v49 = vunpack.i.l.bf16 %v445_v42  ;;  %v83_v52 = vsel %vm82_vm0, %v43_v45, %v437_v43  ;;  %v88_v53 = vsel %vm82_vm0, %v51_v46, %v436_v44 }
  0x96   :  { %v440_v47 = vpop.permute.xlu0 %439 }
  0x97   :  { %v442_v50 = vunpack.i.h.bf16 %v440_v47  ;;  %v441_v51 = vunpack.i.l.bf16 %v440_v47 }
  0x99   :  { %v89_v54 = vsel %vm84_vm1, %v88_v53, %v441_v51  ;;  %v85_v55 = vsel %vm84_vm1, %v83_v52, %v442_v50 }
  0x9a   :  { %v90_v56 = vsel %vm86_vm2, %v89_v54, %v446_v49  ;;  %v87_v57 = vsel %vm86_vm2, %v85_v55, %v447_v48 }
  0x9b   :  { %v92_v58 = vpack.c.bf16 %v90_v56, %v90_v56  ;;  %v91_v59 = vpack.c.bf16 %v87_v57, %v87_v57 }
  0x9d   :  { %329 = vmatprep.mubr.bf16.mxu0 %v92_v58 }
  0x9e   :  { %330 = vmatmul.mubr.bf16.vlgmr.msra.gmra.mxu0 %v91_v59 }
 0x15e   :  { %v331_v3 = vpop.f32.mrf.mxu0 }
 0x15f   :  { %v332_v4 = vadd.f32 %v331_v3, %v130_v1 }
 0x160   :  { %v333_v5 = vpop.f32.mrf.mxu0 }
 0x161   :  { %339 = vst.msk [vmem:[#allocation7] sm:$0x3] %vm338_vm3, %v332_v4  ;;  %v334_v6 = vadd.f32 %v333_v5, %v134_v2  ;;  %346 = vrot.lane.b32.xlu0 %v332_v4, %s569_s1  ;;  %341 = vrot.lane.b32.xlu1 %v332_v4, %s568_s0 }
 0x162   :  { %v335_v7 = vpop.f32.mrf.mxu0 }
 0x163   :  { %357 = vst.msk [vmem:[#allocation7 + $0x8] sm:$0x3] %vm338_vm3, %v334_v6 }
 0x164   :  { %v336_v8 = vpop.f32.mrf.mxu0 }
 0x165   :  { %359 = vrot.lane.b32.xlu0 %v334_v6, %s568_s0  ;;  %351 = vrot.lane.b32.xlu1 %v332_v4, %s563_s15 }
 0x169   :  { %369 = vrot.lane.b32.xlu0 %v334_v6, %s563_s15  ;;  %364 = vrot.lane.b32.xlu1 %v334_v6, %s569_s1 }
 0x1d3   :  { %v347_v9 = vpop.permute.xlu0 %346  ;;  %v342_v10 = vpop.permute.xlu1 %341 }
 0x1d4   :  { %350 = vst.msk [vmem:[#allocation7 + $0x4] sm:$0x3] %vm338_vm3, %v347_v9  ;;  %345 = vst.msk [vmem:[#allocation7 + $0x2] sm:$0x3] %vm338_vm3, %v342_v10 }
 0x1d7   :  { %v360_v11 = vpop.permute.xlu0 %359  ;;  %v352_v12 = vpop.permute.xlu1 %351 }
 0x1d8   :  { %363 = vst.msk [vmem:[#allocation7 + $0xa] sm:$0x3] %vm338_vm3, %v360_v11  ;;  %355 = vst.msk [vmem:[#allocation7 + $0x6] sm:$0x3] %vm338_vm3, %v352_v12 }
 0x1db   :  { %v370_v13 = vpop.permute.xlu0 %369  ;;  %v365_v14 = vpop.permute.xlu1 %364 }
 0x1dc   :  { %373 = vst.msk [vmem:[#allocation7 + $0xe] sm:$0x3] %vm338_vm3, %v370_v13  ;;  %368 = vst.msk [vmem:[#allocation7 + $0xc] sm:$0x3] %vm338_vm3, %v365_v14 }
 0x1dd   :  { %547 = shalt.err (!%p544_p0)
}
 0x1de   :  { %385 = dma.vmem_to_hbm [thread:$0]  %s380_s28, 256, %s629_s3, [#allocation4], %s563_s15, %s563_s15, %s564_s16  }
 0x1df   :  { %560 = dma.done.wait [#allocation4], 256  }
 0x1e0   :  { %561 = vsyncadd [#allocation4], 4294967040 }
 0x1e1   :  { %389 = vsyncpa [#allocation3], 1 }
 0x1e2   :  { %390 = vsyncpa [#allocation6], 1 }
 0x1e3   :  { %391 = vsyncpa [#allocation4], 1 }

</bundles_post_ra>
